<compile_context>
chip_gen: v5e
topology: v5e:2x2
jax: 0.10.0
libtpu: 0.0.40
codegen_flags: <defaults>
</compile_context>

<pallas_src>
import math
import functools

import jax
import jax.numpy as jnp
from jax.experimental import pallas as pl
from jax.experimental.pallas import tpu as pltpu


# ----------------------------------------------------------------------------
# In-kernel math helpers
# ----------------------------------------------------------------------------
_SQRT_HALF = 0.7071067811865476


def _erf(x):
    # Abramowitz & Stegun 7.1.26 rational approximation, |err| <= 1.5e-7
    # (float32-exact for GELU). Uses only abs/mul/add/div/exp, all of which
    # lower cleanly on the TPU VPU/EUP (no reliance on an erf primitive).
    a1, a2, a3, a4, a5 = (0.254829592, -0.284496736, 1.421413741,
                          -1.453152027, 1.061405429)
    p = 0.3275911
    ax = jnp.abs(x)
    t = 1.0 / (1.0 + p * ax)
    poly = t * (a1 + t * (a2 + t * (a3 + t * (a4 + t * a5))))
    e = 1.0 - poly * jnp.exp(-ax * ax)
    return jnp.where(x >= 0, e, -e)


def _gelu_exact(x):
    # nn.GELU() default (erf form).
    return 0.5 * x * (1.0 + _erf(x * _SQRT_HALF))


# ----------------------------------------------------------------------------
# Kernels
# ----------------------------------------------------------------------------
def block_eval_kernel(x_ref, w_ref, b_ref, a_ref, c_ref, o_ref, acc_ref, *,
                      use_bn):
    """Eval-mode fused forward: GEMM -> +bias -> GELU -> BN affine."""
    k = pl.program_id(2)

    @pl.when(k == 0)
    def _():
        acc_ref[...] = jnp.zeros_like(acc_ref)

    acc_ref[...] += jnp.dot(x_ref[...], w_ref[...],
                            preferred_element_type=jnp.float32)

    @pl.when(k == pl.num_programs(2) - 1)
    def _():
        y = acc_ref[...] + b_ref[...]          # (tm, tn) + (1, tn) broadcast
        y = _gelu_exact(y)
        if use_bn:
            y = y * a_ref[...] + c_ref[...]    # folded eval-mode BatchNorm
        o_ref[...] = y.astype(o_ref.dtype)


def block_train_kernel(x_ref, w_ref, b_ref, a_ref, c_ref, mask_ref, o_ref,
                       acc_ref, *, use_bn, inv_keep):
    """Training-mode fused forward with inverted dropout (host-supplied mask)."""
    k = pl.program_id(2)

    @pl.when(k == 0)
    def _():
        acc_ref[...] = jnp.zeros_like(acc_ref)

    acc_ref[...] += jnp.dot(x_ref[...], w_ref[...],
                            preferred_element_type=jnp.float32)

    @pl.when(k == pl.num_programs(2) - 1)
    def _():
        y = acc_ref[...] + b_ref[...]
        y = _gelu_exact(y)
        y = y * (mask_ref[...] * inv_keep)     # inverted dropout
        if use_bn:
            y = y * a_ref[...] + c_ref[...]
        o_ref[...] = y.astype(o_ref.dtype)


# ----------------------------------------------------------------------------
# Wrapper
# ----------------------------------------------------------------------------
def _pick_tile(dim, target, align):
    """Largest divisor of `dim` that is <= target and a multiple of `align`,
    else the full dim (full-extent blocks are always legal)."""
    if dim <= target:
        return dim
    t = (target // align) * align
    while t >= align:
        if dim % t == 0:
            return t
        t -= align
    return dim


def block_forward(x, w, b, *, gamma=None, beta=None, running_mean=None,
                  running_var=None, eps=1e-5, batchnorm=True,
                  training=False, dropout_p=0.1, dropout_rng=None,
                  tm_target=256, tn_target=512, tk_target=512):
    """Fused forward of `Block`.

    x: (M, K) float32;  w: (K, N)  (== torch `fc.weight.T`);  b: (N,)
    BatchNorm applies the supplied (running) statistics, i.e. eval-mode BN.
    """
    # TODO(synk): training-mode BatchNorm (batch statistics + running-stat
    # update) needs a cross-tile batch reduction / second pass; this kernel
    # normalizes with the provided running statistics.
    M, K = x.shape
    K2, N = w.shape
    assert K == K2 and b.shape == (N,)
    out_dtype = x.dtype

    # Fold eval-mode BatchNorm into per-channel affine: y * a + c.
    if batchnorm:
        a = gamma / jnp.sqrt(running_var + eps)
        c = beta - running_mean * a
    else:
        a = jnp.ones((N,), jnp.float32)
        c = jnp.zeros((N,), jnp.float32)

    b2 = b.reshape(1, N).astype(jnp.float32)
    a2 = a.reshape(1, N).astype(jnp.float32)
    c2 = c.reshape(1, N).astype(jnp.float32)

    # Tile sizes: lane-dense N tiles (mult. of 128), sublane-aligned M tiles
    # (mult. of 8), K tiles mult. of 128 (or full dim). Targets keep the
    # double-buffered working set a few MiB -- well inside v7x's 32 MiB
    # default scoped VMEM.
    tm = _pick_tile(M, tm_target, 8)
    tn = _pick_tile(N, tn_target, 128)
    tk = _pick_tile(K, tk_target, 128)
    grid = (M // tm, N // tn, K // tk)

    x_spec = pl.BlockSpec((tm, tk), lambda i, j, k: (i, k))
    w_spec = pl.BlockSpec((tk, tn), lambda i, j, k: (k, j))
    vec_spec = pl.BlockSpec((1, tn), lambda i, j, k: (0, j))   # resident over k
    out_spec = pl.BlockSpec((tm, tn), lambda i, j, k: (i, j))

    scratch = [pltpu.VMEM((tm, tn), jnp.float32)]
    cparams = pltpu.CompilerParams(
        dimension_semantics=("parallel", "parallel", "arbitrary"),
        vmem_limit_bytes=32 * 1024 * 1024,
    )
    out_shape = jax.ShapeDtypeStruct((M, N), out_dtype)
    use_bn = bool(batchnorm)

    if (not training) or dropout_p == 0.0:
        kernel = functools.partial(block_eval_kernel, use_bn=use_bn)
        return pl.pallas_call(
            kernel,
            out_shape=out_shape,
            grid_spec=pltpu.PrefetchScalarGridSpec(
                num_scalar_prefetch=0,
                grid=grid,
                in_specs=[x_spec, w_spec, vec_spec, vec_spec, vec_spec],
                out_specs=out_spec,
                scratch_shapes=scratch,
            ),
            compiler_params=cparams,
        )(x, w, b2, a2, c2)

    # Training path: inverted dropout with a host-generated keep mask.
    # TODO(synk): torch's dropout RNG stream cannot be reproduced bit-for-bit.
    if dropout_rng is None:
        dropout_rng = jax.random.PRNGKey(0)
    keep = jax.random.bernoulli(dropout_rng, 1.0 - dropout_p, (M, N))
    mask = keep.astype(jnp.float32)
    mask_spec = pl.BlockSpec((tm, tn), lambda i, j, k: (i, j))

    kernel = functools.partial(block_train_kernel, use_bn=use_bn,
                               inv_keep=float(1.0 / (1.0 - dropout_p)))
    return pl.pallas_call(
        kernel,
        out_shape=out_shape,
        grid_spec=pltpu.PrefetchScalarGridSpec(
            num_scalar_prefetch=0,
            grid=grid,
            in_specs=[x_spec, w_spec, vec_spec, vec_spec, vec_spec, mask_spec],
            out_specs=out_spec,
            scratch_shapes=scratch,
        ),
        compiler_params=cparams,
    )(x, w, b2, a2, c2, mask)


# ----------------------------------------------------------------------------
# Demo / self-test
# ----------------------------------------------------------------------------
if __name__ == "__main__":
    input_dim, output_dim = 32, 128   # lane-dense output (multiple of 128)
    batch = 8                         # sublane-aligned rows
    eps = 1e-5

    key = jax.random.PRNGKey(0)
    kx, kw, kb, kg, kbe, km, kv, kd = jax.random.split(key, 8)

    x = jax.random.normal(kx, (batch, input_dim), dtype=jnp.float32)
    w = jax.random.normal(kw, (input_dim, output_dim),
                          dtype=jnp.float32) / math.sqrt(input_dim)
    b = 0.1 * jax.random.normal(kb, (output_dim,), dtype=jnp.float32)
    gamma = 1.0 + 0.1 * jax.random.normal(kg, (output_dim,), dtype=jnp.float32)
    beta = 0.1 * jax.random.normal(kbe, (output_dim,), dtype=jnp.float32)
    running_mean = 0.1 * jax.random.normal(km, (output_dim,), dtype=jnp.float32)
    running_var = jax.random.uniform(kv, (output_dim,), dtype=jnp.float32,
                                     minval=0.5, maxval=1.5)

    # Eval-mode forward (dropout identity, BN with running stats) -- matches
    # PyTorch Block.eval() exactly.
    out = block_forward(x, w, b, gamma=gamma, beta=beta,
                        running_mean=running_mean, running_var=running_var,
                        eps=eps, batchnorm=True, training=False)
    out = jax.block_until_ready(out)

    # Plain-JAX reference (exact erf GELU, eval-mode dropout & BatchNorm).
    y = x @ w + b
    y = 0.5 * y * (1.0 + jax.scipy.special.erf(y * _SQRT_HALF))
    ref = (y - running_mean) / jnp.sqrt(running_var + eps) * gamma + beta

    assert out.shape == (batch, output_dim)
    assert jnp.allclose(out, ref, atol=1e-4, rtol=1e-4), (
        "mismatch vs reference, max abs err = %e"
        % float(jnp.max(jnp.abs(out - ref))))

    # Exercise the training-mode dropout path once (host-generated mask).
    out_train = block_forward(x, w, b, gamma=gamma, beta=beta,
                              running_mean=running_mean,
                              running_var=running_var, eps=eps,
                              batchnorm=True, training=True,
                              dropout_p=0.1, dropout_rng=kd)
    out_train = jax.block_until_ready(out_train)
    assert out_train.shape == (batch, output_dim)

    print("KERNEL_OK")
</pallas_src>

<mosaic_0001>
module attributes {stable_mosaic.version = 11 : i64} {
  func.func @block_eval_kernel(%arg0: i32, %arg1: i32, %arg2: i32, %arg3: memref<8x32xf32, #tpu.memory_space<vmem>>, %arg4: memref<32x128xf32, #tpu.memory_space<vmem>>, %arg5: memref<1x128xf32, #tpu.memory_space<vmem>>, %arg6: memref<1x128xf32, #tpu.memory_space<vmem>>, %arg7: memref<1x128xf32, #tpu.memory_space<vmem>>, %arg8: memref<8x128xf32, #tpu.memory_space<vmem>>, %arg9: memref<8x128xf32, #tpu.memory_space<vmem>>) attributes {dimension_semantics = [#tpu.dimension_semantics<parallel>, #tpu.dimension_semantics<parallel>, #tpu.dimension_semantics<arbitrary>], iteration_bounds = array<i64: 1, 1, 1>, scalar_prefetch = 0 : i64, scratch_operands = 1 : i64, tpu.core_type = #tpu.core_type<tc>, window_params = [{transform_indices = @transform_0, window_bounds = array<i64: 8, 32>}, {transform_indices = @transform_1, window_bounds = array<i64: 32, 128>}, {transform_indices = @transform_2, window_bounds = array<i64: 1, 128>}, {transform_indices = @transform_3, window_bounds = array<i64: 1, 128>}, {transform_indices = @transform_4, window_bounds = array<i64: 1, 128>}, {transform_indices = @transform_5, window_bounds = array<i64: 8, 128>}]} {
    %c0_i32 = arith.constant 0 : i32
    %0 = arith.cmpi eq, %arg2, %c0_i32 : i32
    %1 = arith.extui %0 : i1 to i32
    %c0_i32_0 = arith.constant 0 : i32
    %2 = arith.cmpi ne, %1, %c0_i32_0 : i32
    scf.if %2 {
      %cst_10 = arith.constant 0.000000e+00 : f32
      %12 = vector.broadcast %cst_10 : f32 to vector<8x128xf32>
      %c0_11 = arith.constant 0 : index
      %c0_12 = arith.constant 0 : index
      %13 = vector.load %arg9[%c0_11, %c0_12] : memref<8x128xf32, #tpu.memory_space<vmem>>, vector<8x128xf32>
      tpu.vector_store %arg9[%c0_11, %c0_12], %12 {strides = array<i32>} : memref<8x128xf32, #tpu.memory_space<vmem>>, vector<8x128xf32>,
    } else {
    }
    %c0 = arith.constant 0 : index
    %c0_1 = arith.constant 0 : index
    %3 = vector.load %arg9[%c0, %c0_1] : memref<8x128xf32, #tpu.memory_space<vmem>>, vector<8x128xf32>
    %c0_2 = arith.constant 0 : index
    %c0_3 = arith.constant 0 : index
    %4 = vector.load %arg3[%c0_2, %c0_3] : memref<8x32xf32, #tpu.memory_space<vmem>>, vector<8x32xf32>
    %c0_4 = arith.constant 0 : index
    %c0_5 = arith.constant 0 : index
    %5 = vector.load %arg4[%c0_4, %c0_5] : memref<32x128xf32, #tpu.memory_space<vmem>>, vector<32x128xf32>
    %cst = arith.constant dense<0.000000e+00> : vector<8x128xf32>
    %6 = tpu.matmul %4, %5, %cst {dimension_numbers = #tpu.dot_dimension_numbers<[1], [0], [0], [1], [0, 0, 1, 1], [], []>} : vector<8x32xf32>, vector<32x128xf32>, vector<8x128xf32> -> vector<8x128xf32>
    %7 = arith.addf %3, %6 : vector<8x128xf32>
    %c0_6 = arith.constant 0 : index
    %c0_7 = arith.constant 0 : index
    %8 = vector.load %arg9[%c0_6, %c0_7] : memref<8x128xf32, #tpu.memory_space<vmem>>, vector<8x128xf32>
    tpu.vector_store %arg9[%c0_6, %c0_7], %7 {strides = array<i32>} : memref<8x128xf32, #tpu.memory_space<vmem>>, vector<8x128xf32>,
    %c0_i32_8 = arith.constant 0 : i32
    %9 = arith.cmpi eq, %arg2, %c0_i32_8 : i32
    %10 = arith.extui %9 : i1 to i32
    %c0_i32_9 = arith.constant 0 : i32
    %11 = arith.cmpi ne, %10, %c0_i32_9 : i32
    scf.if %11 {
      %c0_10 = arith.constant 0 : index
      %c0_11 = arith.constant 0 : index
      %12 = vector.load %arg9[%c0_10, %c0_11] : memref<8x128xf32, #tpu.memory_space<vmem>>, vector<8x128xf32>
      %c0_12 = arith.constant 0 : index
      %c0_13 = arith.constant 0 : index
      %13 = vector.load %arg5[%c0_12, %c0_13] : memref<1x128xf32, #tpu.memory_space<vmem>>, vector<1x128xf32>
      %14 = vector.broadcast %13 : vector<1x128xf32> to vector<8x128xf32>
      %15 = arith.addf %12, %14 : vector<8x128xf32>
      %cst_14 = arith.constant 5.000000e-01 : f32
      %16 = vector.broadcast %cst_14 : f32 to vector<8x128xf32>
      %17 = arith.mulf %16, %15 : vector<8x128xf32>
      %cst_15 = arith.constant 0.707106769 : f32
      %18 = vector.broadcast %cst_15 : f32 to vector<8x128xf32>
      %19 = arith.mulf %15, %18 : vector<8x128xf32>
      %20 = math.absf %19 : vector<8x128xf32>
      %cst_16 = arith.constant 0.327591091 : f32
      %21 = vector.broadcast %cst_16 : f32 to vector<8x128xf32>
      %22 = arith.mulf %21, %20 : vector<8x128xf32>
      %cst_17 = arith.constant 1.000000e+00 : f32
      %23 = vector.broadcast %cst_17 : f32 to vector<8x128xf32>
      %24 = arith.addf %23, %22 : vector<8x128xf32>
      %cst_18 = arith.constant 1.000000e+00 : f32
      %25 = vector.broadcast %cst_18 : f32 to vector<8x128xf32>
      %26 = arith.divf %25, %24 : vector<8x128xf32>
      %cst_19 = arith.constant 1.06140542 : f32
      %27 = vector.broadcast %cst_19 : f32 to vector<8x128xf32>
      %28 = arith.mulf %26, %27 : vector<8x128xf32>
      %cst_20 = arith.constant -1.45315206 : f32
      %29 = vector.broadcast %cst_20 : f32 to vector<8x128xf32>
      %30 = arith.addf %29, %28 : vector<8x128xf32>
      %31 = arith.mulf %26, %30 : vector<8x128xf32>
      %cst_21 = arith.constant 1.42141378 : f32
      %32 = vector.broadcast %cst_21 : f32 to vector<8x128xf32>
      %33 = arith.addf %32, %31 : vector<8x128xf32>
      %34 = arith.mulf %26, %33 : vector<8x128xf32>
      %cst_22 = arith.constant -0.284496725 : f32
      %35 = vector.broadcast %cst_22 : f32 to vector<8x128xf32>
      %36 = arith.addf %35, %34 : vector<8x128xf32>
      %37 = arith.mulf %26, %36 : vector<8x128xf32>
      %cst_23 = arith.constant 0.254829586 : f32
      %38 = vector.broadcast %cst_23 : f32 to vector<8x128xf32>
      %39 = arith.addf %38, %37 : vector<8x128xf32>
      %40 = arith.mulf %26, %39 : vector<8x128xf32>
      %cst_24 = arith.constant 0.000000e+00 : f32
      %41 = vector.broadcast %cst_24 : f32 to vector<8x128xf32>
      %42 = arith.subf %41, %20 : vector<8x128xf32>
      %43 = arith.mulf %42, %20 : vector<8x128xf32>
      %44 = math.exp %43 : vector<8x128xf32>
      %45 = arith.mulf %40, %44 : vector<8x128xf32>
      %cst_25 = arith.constant 1.000000e+00 : f32
      %46 = vector.broadcast %cst_25 : f32 to vector<8x128xf32>
      %47 = arith.subf %46, %45 : vector<8x128xf32>
      %cst_26 = arith.constant 0.000000e+00 : f32
      %48 = vector.broadcast %cst_26 : f32 to vector<8x128xf32>
      %49 = arith.cmpf oge, %19, %48 : vector<8x128xf32>
      %cst_27 = arith.constant 0.000000e+00 : f32
      %50 = vector.broadcast %cst_27 : f32 to vector<8x128xf32>
      %51 = arith.subf %50, %47 : vector<8x128xf32>
      %52 = arith.select %49, %47, %51 : vector<8x128xi1>, vector<8x128xf32>
      %cst_28 = arith.constant 1.000000e+00 : f32
      %53 = vector.broadcast %cst_28 : f32 to vector<8x128xf32>
      %54 = arith.addf %53, %52 : vector<8x128xf32>
      %55 = arith.mulf %17, %54 : vector<8x128xf32>
      %c0_29 = arith.constant 0 : index
      %c0_30 = arith.constant 0 : index
      %56 = vector.load %arg6[%c0_29, %c0_30] : memref<1x128xf32, #tpu.memory_space<vmem>>, vector<1x128xf32>
      %57 = vector.broadcast %56 : vector<1x128xf32> to vector<8x128xf32>
      %58 = arith.mulf %55, %57 : vector<8x128xf32>
      %c0_31 = arith.constant 0 : index
      %c0_32 = arith.constant 0 : index
      %59 = vector.load %arg7[%c0_31, %c0_32] : memref<1x128xf32, #tpu.memory_space<vmem>>, vector<1x128xf32>
      %60 = vector.broadcast %59 : vector<1x128xf32> to vector<8x128xf32>
      %61 = arith.addf %58, %60 : vector<8x128xf32>
      %c0_33 = arith.constant 0 : index
      %c0_34 = arith.constant 0 : index
      %62 = vector.load %arg8[%c0_33, %c0_34] : memref<8x128xf32, #tpu.memory_space<vmem>>, vector<8x128xf32>
      tpu.vector_store %arg8[%c0_33, %c0_34], %61 {strides = array<i32>} : memref<8x128xf32, #tpu.memory_space<vmem>>, vector<8x128xf32>,
    } else {
    }
    return
  }
  func.func @transform_0(%arg0: i32, %arg1: i32, %arg2: i32) -> (i32, i32) {
    %c0_i32 = arith.constant 0 : i32
    return %arg0, %arg2 : i32, i32
  }
  func.func @transform_1(%arg0: i32, %arg1: i32, %arg2: i32) -> (i32, i32) {
    %c0_i32 = arith.constant 0 : i32
    return %arg2, %arg1 : i32, i32
  }
  func.func @transform_2(%arg0: i32, %arg1: i32, %arg2: i32) -> (i32, i32) {
    %c0_i32 = arith.constant 0 : i32
    %c0_i32_0 = arith.constant 0 : i32
    return %c0_i32, %arg1 : i32, i32
  }
  func.func @transform_3(%arg0: i32, %arg1: i32, %arg2: i32) -> (i32, i32) {
    %c0_i32 = arith.constant 0 : i32
    %c0_i32_0 = arith.constant 0 : i32
    return %c0_i32, %arg1 : i32, i32
  }
  func.func @transform_4(%arg0: i32, %arg1: i32, %arg2: i32) -> (i32, i32) {
    %c0_i32 = arith.constant 0 : i32
    %c0_i32_0 = arith.constant 0 : i32
    return %c0_i32, %arg1 : i32, i32
  }
  func.func @transform_5(%arg0: i32, %arg1: i32, %arg2: i32) -> (i32, i32) {
    %c0_i32 = arith.constant 0 : i32
    return %arg0, %arg1 : i32, i32
  }
}

</mosaic_0001>

<bundles_post_ra>
// kernel: tpu_custom_call.1
= control target key start
LH: loop header
LB: loop body
LE: loop exit
PB: predicated region body
PF: predicated region fallthrough
CT: control target
= control target key end

     0   :  { %10 = vsyncpa [#allocation4], 0  ;;  %s310_s0 = inlined_call_operand.hbm [shape: f32[8,32], index: 0, kind: input, shape index: {}]   ;;  %s311_s1 = inlined_call_operand.hbm [shape: f32[32,128], index: 1, kind: input, shape index: {}]   ;;  %s312_s2 = inlined_call_operand.vmem [shape: f32[1,128], index: 2, kind: input, shape index: {}]   ;;  %s313_s3 = inlined_call_operand.vmem [shape: f32[1,128], index: 3, kind: input, shape index: {}]   ;;  %s314_s4 = inlined_call_operand.vmem [shape: f32[1,128], index: 4, kind: input, shape index: {}]   ;;  %s315_s5 = inlined_call_operand.hbm [shape: f32[8,128], index: 5, kind: output, shape index: {}]  }
   0x1   :  { %11 = vsyncpa [#allocation7], 0 }
   0x2   :  { %12 = vsyncpa [#allocation5], 0  ;;  %s18_s20 = sshll.u32 %s310_s0, 4  ;;  %s257_s21 = smov [#allocation3]   ;;  %s19_s20 = int_to_ptr.hbm [resolvable:$true] %s18_s20 }
   0x3   :  { %s20_s22 = sshll.u32 %s257_s21, 4  ;;  %s28_s25 = sshll.u32 %s311_s1, 4  ;;  %s21_s22 = int_to_ptr.vmem [resolvable:$true] %s20_s22  ;;  %s29_s25 = int_to_ptr.hbm [resolvable:$true] %s28_s25 }
   0x4   :  { %23 = dma.hbm_to_vmem [thread:$0]  %s19_s20, 128, %s21_s22, [#allocation4]  }
   0x5   :  { %s258_s26 = smov [#allocation6]   ;;  %s259_s28 = smov 128  }
   0x6   :  { %s30_s27 = sshll.u32 %s258_s26, 4  ;;  %s260_s29 = smov 8   ;;  %s31_s27 = int_to_ptr.vmem [resolvable:$true] %s30_s27 }
   0x7   :  { %36 = dma.hbm_to_vmem [thread:$0]  %s29_s25, 512, %s31_s27, [#allocation7], %s259_s28, %s259_s28, %s260_s29  }
   0x8   :  { %251 = dma.done.wait [#allocation4], 128  }
   0x9   :  { %252 = vsyncadd [#allocation4], 4294967168 }
   0xa   :  { %253 = dma.done.wait [#allocation7], 512  }
   0xb   :  { %254 = vsyncadd [#allocation7], 4294966784  ;;  %v61_v0 = vld [vmem:[#allocation6 + $0x18] sm:$0xff]  ;;  %v60_v1 = vld [vmem:[#allocation6 + $0x10] sm:$0xff]  ;;  %vm62_vm0 = vcmask 261120   ;;  %s261_s8 = smov [#allocation8]  }
   0xc   :  { %78 = vmatpush.msra.mxu0 %v61_v0  ;;  %v59_v2 = vld [vmem:[#allocation6 + $0x8] sm:$0xff]  ;;  %v58_v3 = vld [vmem:[#allocation6] sm:$0xff]  ;;  %v57_v4 = vld [vmem:[#allocation3] sm:$0xff]  ;;  %s153_s9 = sshll.u32 %s261_s8, 4  ;;  %s155_s12 = sshll.u32 %s315_s5, 4  ;;  %s154_s9 = int_to_ptr.vmem [resolvable:$true] %s153_s9  ;;  %s156_s12 = int_to_ptr.hbm [resolvable:$true] %s155_s12 }
   0xd   :  { %v172_v5 = vld [vmem:[%s312_s2] ss:$0 sm:$0xff] }
   0xe   :  { %79 = vmatpush.msra.mxu0 %v60_v1  ;;  %v173_v41 = vld [vmem:[%s313_s3] ss:$0 sm:$0xff] }
   0xf   :  { %v174_v43 = vld [vmem:[%s314_s4] ss:$0 sm:$0xff] }
  0x10   :  { %80 = vmatpush.msra.mxu0 %v59_v2 }
  0x12   :  { %81 = vmatpush.msra.mxu0 %v58_v3 }
  0x13   :  { %166 = vmatmul.msk.f32.vlgmr.msra.gmra.mxu0 %vm62_vm0, %v57_v4 }
  0x90   :  { %v83_v6 = vpop.f32.mrf.mxu0 }
  0x91   :  { %v96_v7 = vadd.f32 %v172_v5, %v83_v6 }
  0x93   :  { %v98_v8 = vmul.f32 0.70710677, %v96_v7  ;;  %v97_v39 = vmul.f32 0.5, %v96_v7 }
  0x95   :  { %v99_v9 = vand.u32 2147483647, %v98_v8  ;;  %vm132_vm5 = vcmp.ge.f32.partialorder %v98_v8, 0.0 }
  0x97   :  { %v100_v10 = vmul.f32 0.3275911, %v99_v9  ;;  %v126_v22 = vsub.f32 0.0, %v99_v9 }
  0x99   :  { %v101_v11 = vadd.f32 1.0, %v100_v10  ;;  %v127_v25 = vmul.f32 %v126_v22, %v99_v9 }
  0x9b   :  { %175 = vrcp.f32 %v101_v11  ;;  %v113_v15 = vand.u32 2147483648, %v101_v11  ;;  %v111_v17 = vand.u32 2147483647, %v101_v11  ;;  %vm107_vm2 = vweird.f32 %v101_v11 }
  0x9c   :  { %v128_v28 = vmul.f32 1.442695, %v127_v25 }
  0x9d   :  { %v114_v19 = vor.u32 1.1754944e-38, %v113_v15  ;;  %vm112_vm4 = vcmp.eq.f32.partialorder %v111_v17, 8.507059e+37 }
  0x9e   :  { %177 = vpow2.f32 %v128_v28 }
  0xa1   :  { %v176_v12 = vpop.eup %175 }
  0xa2   :  { %v103_v13 = vmul.f32 %v176_v12, %v101_v11  ;;  %vm108_vm1 = vweird.f32 %v176_v12 }
  0xa3   :  { %vm109_vm3 = vmor %vm107_vm2, %vm108_vm1 }
  0xa4   :  { %v104_v14 = vsub.f32 1.0, %v103_v13  ;;  %v178_v34 = vpop.eup %177 }
  0xa6   :  { %v105_v16 = vmul.f32 %v176_v12, %v104_v14 }
  0xa8   :  { %v106_v18 = vadd.f32 %v176_v12, %v105_v16 }
  0xaa   :  { %v110_v20 = vsel %vm109_vm3, %v176_v12, %v106_v18 }
  0xab   :  { %v115_v21 = vsel %vm112_vm4, %v114_v19, %v110_v20 }
  0xac   :  { %v117_v23 = vmul.f32 1.0614054, %v115_v21 }
  0xae   :  { %v118_v24 = vadd.f32 -1.4531521, %v117_v23 }
  0xb0   :  { %v119_v26 = vmul.f32 %v118_v24, %v115_v21 }
  0xb2   :  { %v120_v27 = vadd.f32 1.4214138, %v119_v26 }
  0xb4   :  { %v121_v29 = vmul.f32 %v120_v27, %v115_v21 }
  0xb6   :  { %v122_v30 = vadd.f32 -0.28449672, %v121_v29 }
  0xb8   :  { %v123_v31 = vmul.f32 %v122_v30, %v115_v21 }
  0xba   :  { %v124_v32 = vadd.f32 0.2548296, %v123_v31 }
  0xbc   :  { %v125_v33 = vmul.f32 %v124_v32, %v115_v21 }
  0xbe   :  { %v130_v35 = vmul.f32 %v178_v34, %v125_v33 }
  0xc0   :  { %v131_v36 = vsub.f32 1.0, %v130_v35 }
  0xc2   :  { %v133_v37 = vsub.f32 0.0, %v131_v36 }
  0xc4   :  { %v134_v38 = vsel %vm132_vm5, %v131_v36, %v133_v37 }
  0xc5   :  { %v135_v40 = vadd.f32 1.0, %v134_v38 }
  0xc7   :  { %v136_v42 = vmul.f32 %v135_v40, %v97_v39 }
  0xc9   :  { %v141_v44 = vmul.f32 %v173_v41, %v136_v42 }
  0xcb   :  { %v146_v45 = vadd.f32 %v174_v43, %v141_v44 }
  0xcd   :  { %147 = vst [vmem:[#allocation8] sm:$0xff] %v146_v45 }
  0xce   :  { %158 = dma.vmem_to_hbm [thread:$0]  %s154_s9, 128, %s156_s12, [#allocation5]  }
  0xcf   :  { %255 = dma.done.wait [#allocation5], 128  }
  0xd0   :  { %256 = vsyncadd [#allocation5], 4294967168 }
  0xd1   :  { %163 = vsyncpa [#allocation4], 1 }
  0xd2   :  { %164 = vsyncpa [#allocation7], 1 }
  0xd3   :  { %165 = vsyncpa [#allocation5], 1 }

</bundles_post_ra>
